<compile_context>
chip_gen: v7x
topology: tpu7x:2x2x1
jax: 0.10.0
libtpu: 0.0.40
codegen_flags: <defaults>
</compile_context>

<pallas_src>
import functools

import jax
import jax.numpy as jnp
import numpy as np
from jax.experimental import pallas as pl
from jax.experimental.pallas import tpu as pltpu

EPS = 1e-5


def _down_block_kernel(N, Hp, Wp, Cin, Cmid, Cout,
                       x_ref, spool_ref, mtop_ref, mbot_ref,
                       w1_ref, w2_ref,
                       g1_ref, be1_ref, g2_ref, be2_ref,
                       gsum_ref, gbro_ref,
                       o_ref):
    R = N * Hp                     # matmul M dimension (rows = n*Hp + hp)
    WC = 2 * Wp * Cin              # = W * Cin (lane width of one input row)
    L0 = Wp * Cin                  # pooled lane width
    inv_m = 1.0 / float(N * Hp * Wp)   # BN reduction count over (N, Hp, Wp)

    mtop = mtop_ref[...]           # (R, 1): 0.0 on hp == 0 rows, else 1.0
    mbot = mbot_ref[...]           # (R, 1): 0.0 on hp == Hp-1 rows, else 1.0

    # ---------------- MaxPool2d(2, 2), fully in-kernel ---------------------
    # x_ref[r = n*Hp + hp, hr*W*Cin + w*Cin + c] == x[n, 2*hp + hr, w, c].
    # H-direction max = two lane slices; W-direction max + lane compaction to
    # the (wp*Cin + c) layout = one exact 0/1 selector matmul (MXU), no narrow
    # masked stores and no vector reshapes.
    xa = x_ref[:, 0:WC]
    xb = x_ref[:, WC:2 * WC]
    hmax = jnp.maximum(xa, xb)                                    # (R, W*Cin)
    hsel = jnp.dot(hmax, spool_ref[...],
                   preferred_element_type=jnp.float32)            # (R, 2*L0)
    pooled = jnp.maximum(hsel[:, 0:L0], hsel[:, L0:2 * L0])       # (R, Wp*Cin)

    def conv3x3(h, w_ref_):
        """SAME 3x3 conv as three accumulating bf16 MXU matmuls (one per dy).

        The dy row shift is a sublane roll + boundary-row zero mask (H zero
        padding); the dx taps and W zero padding live in the banded weight.
        """
        hb = h.astype(jnp.bfloat16)
        l0 = (mtop * pltpu.roll(h, shift=1, axis=0)).astype(jnp.bfloat16)
        l2 = (mbot * pltpu.roll(h, shift=R - 1, axis=0)).astype(jnp.bfloat16)
        acc = jnp.dot(l0, w_ref_[0], preferred_element_type=jnp.float32)
        acc = acc + jnp.dot(hb, w_ref_[1], preferred_element_type=jnp.float32)
        acc = acc + jnp.dot(l2, w_ref_[2], preferred_element_type=jnp.float32)
        return acc                                                 # (R, Wp*Co) f32

    def _stack2(a, b, L):
        # (1, L) + (1, L) -> (2, L) without a sublane concatenate (whose
        # lowering has operand-alignment restrictions): iota + select.
        rows = jax.lax.broadcasted_iota(jnp.int32, (2, L), 0)
        return jnp.where(rows == 0,
                         jnp.broadcast_to(a, (2, L)),
                         jnp.broadcast_to(b, (2, L)))

    def batchnorm(acc, g_ref_, be_ref_, C):
        """Training-mode BN with one-pass batch stats, fused selector matmuls."""
        L = Wp * C
        ssum = jnp.sum(acc, axis=0, keepdims=True)                 # (1, L)
        qsum = jnp.sum(acc * acc, axis=0, keepdims=True)           # (1, L)
        st = jnp.dot(_stack2(ssum, qsum, L), gsum_ref[...],
                     preferred_element_type=jnp.float32) * inv_m   # (2, C)
        mean = st[0:1, :]
        var = jnp.maximum(st[1:2, :] - mean * mean, 0.0)           # clamp one-pass var
        scale = g_ref_[...] * jax.lax.rsqrt(var + EPS)             # (1, C)
        shift = be_ref_[...] - mean * scale
        sr = jnp.dot(_stack2(scale, shift, C), gbro_ref[...],
                     preferred_element_type=jnp.float32)           # (2, L)
        return acc * sr[0:1, :] + sr[1:2, :]

    # conv1 + BN1 + ReLU (skip source), conv2 + BN2 + skip add + ReLU.
    acc1 = conv3x3(pooled, w1_ref)                                  # (R, Wp*Cmid)
    y1 = jnp.maximum(batchnorm(acc1, g1_ref, be1_ref, Cmid), 0.0)   # f32 skip
    acc2 = conv3x3(y1, w2_ref)                                      # (R, Wp*Cout)
    o_ref[...] = jnp.maximum(batchnorm(acc2, g2_ref, be2_ref, Cout) + y1, 0.0)


def _banded_conv_weight(w, Wp):
    """HWIO (3,3,Ci,Co) -> (3, Wp*Ci, Wp*Co) per-dy banded matrices.

    The dx taps are baked in; clipping at the wp edges implements the W-side
    zero padding of the SAME conv, so the kernel needs no W halo at all.
    """
    Ci, Co = int(w.shape[2]), int(w.shape[3])
    sel = np.zeros((3, Wp, Wp), np.float32)
    for dx in range(3):
        for wp in range(Wp):
            wq = wp + dx - 1
            if 0 <= wq < Wp:
                sel[dx, wq, wp] = 1.0
    wb = jnp.einsum('xwp,yxio->ywipo', jnp.asarray(sel), w.astype(jnp.float32))
    return wb.reshape(3, Wp * Ci, Wp * Co)


def _pool_selector(Wp, Cin):
    """(W*Cin, 2*Wp*Cin) exact 0/1 matrix: cols [0,Wp*Cin) pick even-w Cin
    groups, cols [Wp*Cin, 2*Wp*Cin) pick odd-w groups (lane compaction on MXU)."""
    s = np.zeros((2 * Wp * Cin, 2 * Wp * Cin), np.float32)
    for wp in range(Wp):
        for c in range(Cin):
            s[(2 * wp) * Cin + c, wp * Cin + c] = 1.0
            s[(2 * wp + 1) * Cin + c, Wp * Cin + wp * Cin + c] = 1.0
    return jnp.asarray(s)


def _row_masks(N, Hp):
    """Boundary-row masks for the dy=0 / dy=2 shifted conv operands."""
    hp = np.arange(N * Hp) % Hp
    mtop = (hp != 0).astype(np.float32).reshape(-1, 1)
    mbot = (hp != Hp - 1).astype(np.float32).reshape(-1, 1)
    return jnp.asarray(mtop), jnp.asarray(mbot)


def _bn_group_mats(Wp, C):
    """Per-channel sum selector (Wp*C, C) and its broadcast-back transpose."""
    gsum = np.tile(np.eye(C, dtype=np.float32), (Wp, 1))
    return jnp.asarray(gsum), jnp.asarray(np.ascontiguousarray(gsum.T))


def down_block(x, params, *, stride=2):
    """x: (N, H, W, Cin) float32 NHWC.  Returns (N, Hp, Wp, Cout) NHWC.

    Wrap in jax.jit for repeated calls so the host-side banded-weight /
    selector construction is folded once at trace time.
    """
    assert stride == 2 and x.shape[1] % 2 == 0 and x.shape[2] % 2 == 0
    N, H, W, Cin = x.shape
    w1, _b1, g1, be1, w2, _b2, g2, be2 = params   # conv biases cancel under BN
    Cmid, Cout = int(w1.shape[-1]), int(w2.shape[-1])
    assert Cmid == Cout, "ConvBlock skip-add requires mid_channels == out_channels"
    Hp, Wp = H // 2, W // 2
    R = N * Hp

    # Free (layout-preserving) reshape: row = n*Hp + hp, lane = hr*W*Cin + w*Cin + c.
    x2d = x.reshape(R, 2 * W * Cin)
    spool = _pool_selector(Wp, Cin)
    mtop, mbot = _row_masks(N, Hp)
    w1b = _banded_conv_weight(w1, Wp).astype(jnp.bfloat16)   # bf16 MXU operands
    w2b = _banded_conv_weight(w2, Wp).astype(jnp.bfloat16)
    gsum, gbro = _bn_group_mats(Wp, Cout)                    # Cmid == Cout: shared
    row = lambda v: v.reshape(1, -1).astype(jnp.float32)

    kernel = functools.partial(_down_block_kernel, N, Hp, Wp, Cin, Cmid, Cout)
    vmem = pl.BlockSpec(memory_space=pltpu.MemorySpace.VMEM)
    out2d = pl.pallas_call(
        kernel,
        out_shape=jax.ShapeDtypeStruct((R, Wp * Cout), jnp.float32),
        in_specs=[vmem] * 12,
        out_specs=vmem,
        compiler_params=pltpu.CompilerParams(vmem_limit_bytes=64 * 1024 * 1024),
    )(x2d, spool, mtop, mbot, w1b, w2b,
      row(g1), row(be1), row(g2), row(be2), gsum, gbro)
    # Free reshape back: row = n*Hp + hp, lane = wp*Cout + c  ->  NHWC.
    return out2d.reshape(N, Hp, Wp, Cout)


def reference(x, params, *, stride=2, q=None):
    """Plain-JAX (XLA) reference of DownBlock.forward in NHWC.

    q (optional) quantizes the conv operands, used to mirror the kernel's bf16
    MXU-operand rounding for a tight numerical check."""
    if q is None:
        q = lambda a: a
    w1, b1, g1, be1, w2, b2, g2, be2 = params
    N, H, W, _ = x.shape
    Hp = (H - 2) // stride + 1
    Wp = (W - 2) // stride + 1
    x00 = x[:, 0::stride, 0::stride, :][:, :Hp, :Wp, :]
    x01 = x[:, 0::stride, 1::stride, :][:, :Hp, :Wp, :]
    x10 = x[:, 1::stride, 0::stride, :][:, :Hp, :Wp, :]
    x11 = x[:, 1::stride, 1::stride, :][:, :Hp, :Wp, :]
    pooled = jnp.maximum(jnp.maximum(x00, x01), jnp.maximum(x10, x11))

    def conv(h, w, b):
        y = jax.lax.conv_general_dilated(
            q(h), q(w), (1, 1), 'SAME',
            dimension_numbers=('NHWC', 'HWIO', 'NHWC'),
            precision=jax.lax.Precision.HIGHEST)
        return y + b

    def bn(h, g, be):
        m = jnp.mean(h, axis=(0, 1, 2), keepdims=True)
        v = jnp.mean((h - m) ** 2, axis=(0, 1, 2), keepdims=True)
        return (h - m) / jnp.sqrt(v + EPS) * g + be

    h = jnp.maximum(bn(conv(pooled, w1, b1), g1, be1), 0.0)
    skip = h
    h = bn(conv(h, w2, b2), g2, be2) + skip
    return jnp.maximum(h, 0.0)


if __name__ == "__main__":
    N, Cin, H, W = 2, 4, 16, 16          # PyTorch input x: (N, Cin, H, W)
    Cout = 8
    Cmid = Cout                           # mid_channels defaults to out_channels
    stride = 2                            # DownBlock(..., stride=2)

    key = jax.random.PRNGKey(0)
    ks = jax.random.split(key, 9)
    x_nchw = jax.random.normal(ks[0], (N, Cin, H, W), jnp.float32)
    x = jnp.transpose(x_nchw, (0, 2, 3, 1))          # NCHW -> NHWC

    # Deterministic synthetic parameters (shapes from the module __init__).
    w1 = 0.2 * jax.random.normal(ks[1], (3, 3, Cin, Cmid), jnp.float32)   # HWIO
    b1 = 0.1 * jax.random.normal(ks[2], (Cmid,), jnp.float32)
    g1 = 1.0 + 0.1 * jax.random.normal(ks[3], (Cmid,), jnp.float32)
    be1 = 0.1 * jax.random.normal(ks[4], (Cmid,), jnp.float32)
    w2 = 0.2 * jax.random.normal(ks[5], (3, 3, Cmid, Cout), jnp.float32)  # HWIO
    b2 = 0.1 * jax.random.normal(ks[6], (Cout,), jnp.float32)
    g2 = 1.0 + 0.1 * jax.random.normal(ks[7], (Cout,), jnp.float32)
    be2 = 0.1 * jax.random.normal(ks[8], (Cout,), jnp.float32)
    params = (w1, b1, g1, be1, w2, b2, g2, be2)

    out = jax.block_until_ready(down_block(x, params, stride=stride))
    assert out.shape == (N, H // 2, W // 2, Cout)

    # Tight check against a reference that mirrors the kernel's bf16 MXU-operand
    # rounding (validates the fused pool/conv/BN/skip math itself).
    q_bf16 = lambda a: a.astype(jnp.bfloat16).astype(jnp.float32)
    ref_q = jax.block_until_ready(reference(x, params, stride=stride, q=q_bf16))
    np.testing.assert_allclose(np.asarray(out), np.asarray(ref_q),
                               atol=2e-3, rtol=2e-3)

    # Loose check against the pure-f32 module semantics (the only difference is
    # the bf16 rounding of the MXU operands).
    ref = jax.block_until_ready(reference(x, params, stride=stride))
    np.testing.assert_allclose(np.asarray(out), np.asarray(ref),
                               atol=5e-2, rtol=5e-2)
    print("KERNEL_OK")
</pallas_src>

<mosaic_0001>
module attributes {stable_mosaic.version = 11 : i64} {
  func.func @_down_block_kernel(%arg0: memref<16x128xf32, #tpu.memory_space<vmem>>, %arg1: memref<64x64xf32, #tpu.memory_space<vmem>>, %arg2: memref<16x1xf32, #tpu.memory_space<vmem>>, %arg3: memref<16x1xf32, #tpu.memory_space<vmem>>, %arg4: memref<3x32x64xbf16, #tpu.memory_space<vmem>>, %arg5: memref<3x64x64xbf16, #tpu.memory_space<vmem>>, %arg6: memref<1x8xf32, #tpu.memory_space<vmem>>, %arg7: memref<1x8xf32, #tpu.memory_space<vmem>>, %arg8: memref<1x8xf32, #tpu.memory_space<vmem>>, %arg9: memref<1x8xf32, #tpu.memory_space<vmem>>, %arg10: memref<64x8xf32, #tpu.memory_space<vmem>>, %arg11: memref<8x64xf32, #tpu.memory_space<vmem>>, %arg12: memref<16x64xf32, #tpu.memory_space<vmem>>) attributes {dimension_semantics = [], scalar_prefetch = 0 : i64, scratch_operands = 0 : i64, tpu.core_type = #tpu.core_type<tc>} {
    %c0 = arith.constant 0 : index
    %c0_0 = arith.constant 0 : index
    %0 = vector.load %arg2[%c0, %c0_0] : memref<16x1xf32, #tpu.memory_space<vmem>>, vector<16x1xf32>
    %c0_1 = arith.constant 0 : index
    %c0_2 = arith.constant 0 : index
    %1 = vector.load %arg3[%c0_1, %c0_2] : memref<16x1xf32, #tpu.memory_space<vmem>>, vector<16x1xf32>
    %c0_3 = arith.constant 0 : index
    %c0_4 = arith.constant 0 : index
    %2 = vector.load %arg0[%c0_3, %c0_4] : memref<16x128xf32, #tpu.memory_space<vmem>>, vector<16x64xf32>
    %c0_5 = arith.constant 0 : index
    %c64 = arith.constant 64 : index
    %3 = vector.load %arg0[%c0_5, %c64] : memref<16x128xf32, #tpu.memory_space<vmem>>, vector<16x64xf32>
    %4 = arith.maximumf %2, %3 : vector<16x64xf32>
    %c0_6 = arith.constant 0 : index
    %c0_7 = arith.constant 0 : index
    %5 = vector.load %arg1[%c0_6, %c0_7] : memref<64x64xf32, #tpu.memory_space<vmem>>, vector<64x64xf32>
    %cst = arith.constant dense<0.000000e+00> : vector<16x64xf32>
    %6 = tpu.matmul %4, %5, %cst {dimension_numbers = #tpu.dot_dimension_numbers<[1], [0], [0], [1], [0, 0, 1, 1], [], []>} : vector<16x64xf32>, vector<64x64xf32>, vector<16x64xf32> -> vector<16x64xf32>
    %7 = vector.extract_strided_slice %6 {offsets = [0, 0], sizes = [16, 32], strides = [1, 1]} : vector<16x64xf32> to vector<16x32xf32>
    %8 = vector.extract_strided_slice %6 {offsets = [0, 32], sizes = [16, 32], strides = [1, 1]} : vector<16x64xf32> to vector<16x32xf32>
    %9 = arith.maximumf %7, %8 : vector<16x32xf32>
    %10 = arith.truncf %9 : vector<16x32xf32> to vector<16x32xbf16>
    %c1_i32 = arith.constant 1 : i32
    %11 = tpu.dynamic_rotate %9 by %c1_i32 dim 0 : vector<16x32xf32>, i32 -> vector<16x32xf32>
    %12 = vector.broadcast %0 : vector<16x1xf32> to vector<16x32xf32>
    %13 = arith.mulf %12, %11 : vector<16x32xf32>
    %14 = arith.truncf %13 : vector<16x32xf32> to vector<16x32xbf16>
    %c15_i32 = arith.constant 15 : i32
    %15 = tpu.dynamic_rotate %9 by %c15_i32 dim 0 : vector<16x32xf32>, i32 -> vector<16x32xf32>
    %16 = vector.broadcast %1 : vector<16x1xf32> to vector<16x32xf32>
    %17 = arith.mulf %16, %15 : vector<16x32xf32>
    %18 = arith.truncf %17 : vector<16x32xf32> to vector<16x32xbf16>
    %c0_8 = arith.constant 0 : index
    %c0_9 = arith.constant 0 : index
    %c0_10 = arith.constant 0 : index
    %19 = vector.load %arg4[%c0_8, %c0_9, %c0_10] : memref<3x32x64xbf16, #tpu.memory_space<vmem>>, vector<1x32x64xbf16>
    %20 = vector.shape_cast %19 : vector<1x32x64xbf16> to vector<32x64xbf16>
    %cst_11 = arith.constant dense<0.000000e+00> : vector<16x64xf32>
    %21 = tpu.matmul %14, %20, %cst_11 {dimension_numbers = #tpu.dot_dimension_numbers<[1], [0], [0], [1], [0, 0, 1, 1], [], []>} : vector<16x32xbf16>, vector<32x64xbf16>, vector<16x64xf32> -> vector<16x64xf32>
    %c1 = arith.constant 1 : index
    %c0_12 = arith.constant 0 : index
    %c0_13 = arith.constant 0 : index
    %22 = vector.load %arg4[%c1, %c0_12, %c0_13] : memref<3x32x64xbf16, #tpu.memory_space<vmem>>, vector<1x32x64xbf16>
    %23 = vector.shape_cast %22 : vector<1x32x64xbf16> to vector<32x64xbf16>
    %cst_14 = arith.constant dense<0.000000e+00> : vector<16x64xf32>
    %24 = tpu.matmul %10, %23, %cst_14 {dimension_numbers = #tpu.dot_dimension_numbers<[1], [0], [0], [1], [0, 0, 1, 1], [], []>} : vector<16x32xbf16>, vector<32x64xbf16>, vector<16x64xf32> -> vector<16x64xf32>
    %25 = arith.addf %21, %24 : vector<16x64xf32>
    %c2 = arith.constant 2 : index
    %c0_15 = arith.constant 0 : index
    %c0_16 = arith.constant 0 : index
    %26 = vector.load %arg4[%c2, %c0_15, %c0_16] : memref<3x32x64xbf16, #tpu.memory_space<vmem>>, vector<1x32x64xbf16>
    %27 = vector.shape_cast %26 : vector<1x32x64xbf16> to vector<32x64xbf16>
    %cst_17 = arith.constant dense<0.000000e+00> : vector<16x64xf32>
    %28 = tpu.matmul %18, %27, %cst_17 {dimension_numbers = #tpu.dot_dimension_numbers<[1], [0], [0], [1], [0, 0, 1, 1], [], []>} : vector<16x32xbf16>, vector<32x64xbf16>, vector<16x64xf32> -> vector<16x64xf32>
    %29 = arith.addf %25, %28 : vector<16x64xf32>
    %cst_18 = arith.constant dense<0.000000e+00> : vector<64xf32>
    %30 = vector.multi_reduction <add>, %29, %cst_18 [0] : vector<16x64xf32> to vector<64xf32>
    %31 = vector.shape_cast %30 : vector<64xf32> to vector<1x64xf32>
    %32 = arith.mulf %29, %29 : vector<16x64xf32>
    %cst_19 = arith.constant dense<0.000000e+00> : vector<64xf32>
    %33 = vector.multi_reduction <add>, %32, %cst_19 [0] : vector<16x64xf32> to vector<64xf32>
    %34 = vector.shape_cast %33 : vector<64xf32> to vector<1x64xf32>
    %35 = tpu.iota {dimensions = array<i32: 0>} : vector<2x64xi32>
    %c0_i32 = arith.constant 0 : i32
    %36 = vector.broadcast %c0_i32 : i32 to vector<2x64xi32>
    %37 = arith.cmpi eq, %35, %36 : vector<2x64xi32>
    %38 = vector.shape_cast %31 : vector<1x64xf32> to vector<1x64xf32>
    %39 = vector.broadcast %38 : vector<1x64xf32> to vector<2x64xf32>
    %40 = vector.shape_cast %34 : vector<1x64xf32> to vector<1x64xf32>
    %41 = vector.broadcast %40 : vector<1x64xf32> to vector<2x64xf32>
    %42 = arith.select %37, %39, %41 : vector<2x64xi1>, vector<2x64xf32>
    %c0_20 = arith.constant 0 : index
    %c0_21 = arith.constant 0 : index
    %43 = vector.load %arg10[%c0_20, %c0_21] : memref<64x8xf32, #tpu.memory_space<vmem>>, vector<64x8xf32>
    %cst_22 = arith.constant dense<0.000000e+00> : vector<2x8xf32>
    %44 = tpu.matmul %42, %43, %cst_22 {dimension_numbers = #tpu.dot_dimension_numbers<[1], [0], [0], [1], [0, 0, 1, 1], [], []>} : vector<2x64xf32>, vector<64x8xf32>, vector<2x8xf32> -> vector<2x8xf32>
    %cst_23 = arith.constant 7.812500e-03 : f32
    %45 = vector.broadcast %cst_23 : f32 to vector<2x8xf32>
    %46 = arith.mulf %44, %45 : vector<2x8xf32>
    %47 = vector.extract_strided_slice %46 {offsets = [0, 0], sizes = [1, 8], strides = [1, 1]} : vector<2x8xf32> to vector<1x8xf32>
    %48 = vector.extract_strided_slice %46 {offsets = [1, 0], sizes = [1, 8], strides = [1, 1]} : vector<2x8xf32> to vector<1x8xf32>
    %49 = arith.mulf %47, %47 : vector<1x8xf32>
    %50 = arith.subf %48, %49 : vector<1x8xf32>
    %cst_24 = arith.constant 0.000000e+00 : f32
    %51 = vector.broadcast %cst_24 : f32 to vector<1x8xf32>
    %52 = arith.maximumf %50, %51 : vector<1x8xf32>
    %c0_25 = arith.constant 0 : index
    %c0_26 = arith.constant 0 : index
    %53 = vector.load %arg6[%c0_25, %c0_26] : memref<1x8xf32, #tpu.memory_space<vmem>>, vector<1x8xf32>
    %cst_27 = arith.constant 9.99999974E-6 : f32
    %54 = vector.broadcast %cst_27 : f32 to vector<1x8xf32>
    %55 = arith.addf %52, %54 : vector<1x8xf32>
    %56 = math.rsqrt %55 : vector<1x8xf32>
    %57 = arith.mulf %53, %56 : vector<1x8xf32>
    %c0_28 = arith.constant 0 : index
    %c0_29 = arith.constant 0 : index
    %58 = vector.load %arg7[%c0_28, %c0_29] : memref<1x8xf32, #tpu.memory_space<vmem>>, vector<1x8xf32>
    %59 = arith.mulf %47, %57 : vector<1x8xf32>
    %60 = arith.subf %58, %59 : vector<1x8xf32>
    %61 = tpu.iota {dimensions = array<i32: 0>} : vector<2x8xi32>
    %c0_i32_30 = arith.constant 0 : i32
    %62 = vector.broadcast %c0_i32_30 : i32 to vector<2x8xi32>
    %63 = arith.cmpi eq, %61, %62 : vector<2x8xi32>
    %64 = vector.shape_cast %57 : vector<1x8xf32> to vector<1x8xf32>
    %65 = vector.broadcast %64 : vector<1x8xf32> to vector<2x8xf32>
    %66 = vector.shape_cast %60 : vector<1x8xf32> to vector<1x8xf32>
    %67 = vector.broadcast %66 : vector<1x8xf32> to vector<2x8xf32>
    %68 = arith.select %63, %65, %67 : vector<2x8xi1>, vector<2x8xf32>
    %c0_31 = arith.constant 0 : index
    %c0_32 = arith.constant 0 : index
    %69 = vector.load %arg11[%c0_31, %c0_32] : memref<8x64xf32, #tpu.memory_space<vmem>>, vector<8x64xf32>
    %cst_33 = arith.constant dense<0.000000e+00> : vector<2x64xf32>
    %70 = tpu.matmul %68, %69, %cst_33 {dimension_numbers = #tpu.dot_dimension_numbers<[1], [0], [0], [1], [0, 0, 1, 1], [], []>} : vector<2x8xf32>, vector<8x64xf32>, vector<2x64xf32> -> vector<2x64xf32>
    %71 = vector.extract_strided_slice %70 {offsets = [0, 0], sizes = [1, 64], strides = [1, 1]} : vector<2x64xf32> to vector<1x64xf32>
    %72 = vector.broadcast %71 : vector<1x64xf32> to vector<16x64xf32>
    %73 = arith.mulf %29, %72 : vector<16x64xf32>
    %74 = vector.extract_strided_slice %70 {offsets = [1, 0], sizes = [1, 64], strides = [1, 1]} : vector<2x64xf32> to vector<1x64xf32>
    %75 = vector.broadcast %74 : vector<1x64xf32> to vector<16x64xf32>
    %76 = arith.addf %73, %75 : vector<16x64xf32>
    %cst_34 = arith.constant 0.000000e+00 : f32
    %77 = vector.broadcast %cst_34 : f32 to vector<16x64xf32>
    %78 = arith.maximumf %76, %77 : vector<16x64xf32>
    %79 = arith.truncf %78 : vector<16x64xf32> to vector<16x64xbf16>
    %c1_i32_35 = arith.constant 1 : i32
    %80 = tpu.dynamic_rotate %78 by %c1_i32_35 dim 0 : vector<16x64xf32>, i32 -> vector<16x64xf32>
    %81 = vector.broadcast %0 : vector<16x1xf32> to vector<16x64xf32>
    %82 = arith.mulf %81, %80 : vector<16x64xf32>
    %83 = arith.truncf %82 : vector<16x64xf32> to vector<16x64xbf16>
    %c15_i32_36 = arith.constant 15 : i32
    %84 = tpu.dynamic_rotate %78 by %c15_i32_36 dim 0 : vector<16x64xf32>, i32 -> vector<16x64xf32>
    %85 = vector.broadcast %1 : vector<16x1xf32> to vector<16x64xf32>
    %86 = arith.mulf %85, %84 : vector<16x64xf32>
    %87 = arith.truncf %86 : vector<16x64xf32> to vector<16x64xbf16>
    %c0_37 = arith.constant 0 : index
    %c0_38 = arith.constant 0 : index
    %c0_39 = arith.constant 0 : index
    %88 = vector.load %arg5[%c0_37, %c0_38, %c0_39] : memref<3x64x64xbf16, #tpu.memory_space<vmem>>, vector<1x64x64xbf16>
    %89 = vector.shape_cast %88 : vector<1x64x64xbf16> to vector<64x64xbf16>
    %cst_40 = arith.constant dense<0.000000e+00> : vector<16x64xf32>
    %90 = tpu.matmul %83, %89, %cst_40 {dimension_numbers = #tpu.dot_dimension_numbers<[1], [0], [0], [1], [0, 0, 1, 1], [], []>} : vector<16x64xbf16>, vector<64x64xbf16>, vector<16x64xf32> -> vector<16x64xf32>
    %c1_41 = arith.constant 1 : index
    %c0_42 = arith.constant 0 : index
    %c0_43 = arith.constant 0 : index
    %91 = vector.load %arg5[%c1_41, %c0_42, %c0_43] : memref<3x64x64xbf16, #tpu.memory_space<vmem>>, vector<1x64x64xbf16>
    %92 = vector.shape_cast %91 : vector<1x64x64xbf16> to vector<64x64xbf16>
    %cst_44 = arith.constant dense<0.000000e+00> : vector<16x64xf32>
    %93 = tpu.matmul %79, %92, %cst_44 {dimension_numbers = #tpu.dot_dimension_numbers<[1], [0], [0], [1], [0, 0, 1, 1], [], []>} : vector<16x64xbf16>, vector<64x64xbf16>, vector<16x64xf32> -> vector<16x64xf32>
    %94 = arith.addf %90, %93 : vector<16x64xf32>
    %c2_45 = arith.constant 2 : index
    %c0_46 = arith.constant 0 : index
    %c0_47 = arith.constant 0 : index
    %95 = vector.load %arg5[%c2_45, %c0_46, %c0_47] : memref<3x64x64xbf16, #tpu.memory_space<vmem>>, vector<1x64x64xbf16>
    %96 = vector.shape_cast %95 : vector<1x64x64xbf16> to vector<64x64xbf16>
    %cst_48 = arith.constant dense<0.000000e+00> : vector<16x64xf32>
    %97 = tpu.matmul %87, %96, %cst_48 {dimension_numbers = #tpu.dot_dimension_numbers<[1], [0], [0], [1], [0, 0, 1, 1], [], []>} : vector<16x64xbf16>, vector<64x64xbf16>, vector<16x64xf32> -> vector<16x64xf32>
    %98 = arith.addf %94, %97 : vector<16x64xf32>
    %cst_49 = arith.constant dense<0.000000e+00> : vector<64xf32>
    %99 = vector.multi_reduction <add>, %98, %cst_49 [0] : vector<16x64xf32> to vector<64xf32>
    %100 = vector.shape_cast %99 : vector<64xf32> to vector<1x64xf32>
    %101 = arith.mulf %98, %98 : vector<16x64xf32>
    %cst_50 = arith.constant dense<0.000000e+00> : vector<64xf32>
    %102 = vector.multi_reduction <add>, %101, %cst_50 [0] : vector<16x64xf32> to vector<64xf32>
    %103 = vector.shape_cast %102 : vector<64xf32> to vector<1x64xf32>
    %104 = tpu.iota {dimensions = array<i32: 0>} : vector<2x64xi32>
    %c0_i32_51 = arith.constant 0 : i32
    %105 = vector.broadcast %c0_i32_51 : i32 to vector<2x64xi32>
    %106 = arith.cmpi eq, %104, %105 : vector<2x64xi32>
    %107 = vector.shape_cast %100 : vector<1x64xf32> to vector<1x64xf32>
    %108 = vector.broadcast %107 : vector<1x64xf32> to vector<2x64xf32>
    %109 = vector.shape_cast %103 : vector<1x64xf32> to vector<1x64xf32>
    %110 = vector.broadcast %109 : vector<1x64xf32> to vector<2x64xf32>
    %111 = arith.select %106, %108, %110 : vector<2x64xi1>, vector<2x64xf32>
    %c0_52 = arith.constant 0 : index
    %c0_53 = arith.constant 0 : index
    %112 = vector.load %arg10[%c0_52, %c0_53] : memref<64x8xf32, #tpu.memory_space<vmem>>, vector<64x8xf32>
    %cst_54 = arith.constant dense<0.000000e+00> : vector<2x8xf32>
    %113 = tpu.matmul %111, %112, %cst_54 {dimension_numbers = #tpu.dot_dimension_numbers<[1], [0], [0], [1], [0, 0, 1, 1], [], []>} : vector<2x64xf32>, vector<64x8xf32>, vector<2x8xf32> -> vector<2x8xf32>
    %cst_55 = arith.constant 7.812500e-03 : f32
    %114 = vector.broadcast %cst_55 : f32 to vector<2x8xf32>
    %115 = arith.mulf %113, %114 : vector<2x8xf32>
    %116 = vector.extract_strided_slice %115 {offsets = [0, 0], sizes = [1, 8], strides = [1, 1]} : vector<2x8xf32> to vector<1x8xf32>
    %117 = vector.extract_strided_slice %115 {offsets = [1, 0], sizes = [1, 8], strides = [1, 1]} : vector<2x8xf32> to vector<1x8xf32>
    %118 = arith.mulf %116, %116 : vector<1x8xf32>
    %119 = arith.subf %117, %118 : vector<1x8xf32>
    %cst_56 = arith.constant 0.000000e+00 : f32
    %120 = vector.broadcast %cst_56 : f32 to vector<1x8xf32>
    %121 = arith.maximumf %119, %120 : vector<1x8xf32>
    %c0_57 = arith.constant 0 : index
    %c0_58 = arith.constant 0 : index
    %122 = vector.load %arg8[%c0_57, %c0_58] : memref<1x8xf32, #tpu.memory_space<vmem>>, vector<1x8xf32>
    %cst_59 = arith.constant 9.99999974E-6 : f32
    %123 = vector.broadcast %cst_59 : f32 to vector<1x8xf32>
    %124 = arith.addf %121, %123 : vector<1x8xf32>
    %125 = math.rsqrt %124 : vector<1x8xf32>
    %126 = arith.mulf %122, %125 : vector<1x8xf32>
    %c0_60 = arith.constant 0 : index
    %c0_61 = arith.constant 0 : index
    %127 = vector.load %arg9[%c0_60, %c0_61] : memref<1x8xf32, #tpu.memory_space<vmem>>, vector<1x8xf32>
    %128 = arith.mulf %116, %126 : vector<1x8xf32>
    %129 = arith.subf %127, %128 : vector<1x8xf32>
    %130 = tpu.iota {dimensions = array<i32: 0>} : vector<2x8xi32>
    %c0_i32_62 = arith.constant 0 : i32
    %131 = vector.broadcast %c0_i32_62 : i32 to vector<2x8xi32>
    %132 = arith.cmpi eq, %130, %131 : vector<2x8xi32>
    %133 = vector.shape_cast %126 : vector<1x8xf32> to vector<1x8xf32>
    %134 = vector.broadcast %133 : vector<1x8xf32> to vector<2x8xf32>
    %135 = vector.shape_cast %129 : vector<1x8xf32> to vector<1x8xf32>
    %136 = vector.broadcast %135 : vector<1x8xf32> to vector<2x8xf32>
    %137 = arith.select %132, %134, %136 : vector<2x8xi1>, vector<2x8xf32>
    %c0_63 = arith.constant 0 : index
    %c0_64 = arith.constant 0 : index
    %138 = vector.load %arg11[%c0_63, %c0_64] : memref<8x64xf32, #tpu.memory_space<vmem>>, vector<8x64xf32>
    %cst_65 = arith.constant dense<0.000000e+00> : vector<2x64xf32>
    %139 = tpu.matmul %137, %138, %cst_65 {dimension_numbers = #tpu.dot_dimension_numbers<[1], [0], [0], [1], [0, 0, 1, 1], [], []>} : vector<2x8xf32>, vector<8x64xf32>, vector<2x64xf32> -> vector<2x64xf32>
    %140 = vector.extract_strided_slice %139 {offsets = [0, 0], sizes = [1, 64], strides = [1, 1]} : vector<2x64xf32> to vector<1x64xf32>
    %141 = vector.broadcast %140 : vector<1x64xf32> to vector<16x64xf32>
    %142 = arith.mulf %98, %141 : vector<16x64xf32>
    %143 = vector.extract_strided_slice %139 {offsets = [1, 0], sizes = [1, 64], strides = [1, 1]} : vector<2x64xf32> to vector<1x64xf32>
    %144 = vector.broadcast %143 : vector<1x64xf32> to vector<16x64xf32>
    %145 = arith.addf %142, %144 : vector<16x64xf32>
    %146 = arith.addf %145, %78 : vector<16x64xf32>
    %cst_66 = arith.constant 0.000000e+00 : f32
    %147 = vector.broadcast %cst_66 : f32 to vector<16x64xf32>
    %148 = arith.maximumf %146, %147 : vector<16x64xf32>
    %c0_67 = arith.constant 0 : index
    %c0_68 = arith.constant 0 : index
    %149 = vector.load %arg12[%c0_67, %c0_68] : memref<16x64xf32, #tpu.memory_space<vmem>>, vector<16x64xf32>
    tpu.vector_store %arg12[%c0_67, %c0_68], %148 {strides = array<i32>} : memref<16x64xf32, #tpu.memory_space<vmem>>, vector<16x64xf32>,
    return
  }
}

</mosaic_0001>

<bundles_post_ra>
// kernel: tpu_custom_call.1
= control target key start
LH: loop header
LB: loop body
LE: loop exit
PB: predicated region body
PF: predicated region fallthrough
CT: control target
= control target key end

     0   :  { %17 = vsyncpa [#allocation3], 0  ;;  %s2368_s0 = inlined_call_operand.hbm [shape: f32[16,128], index: 0, kind: input, shape index: {}]   ;;  %s2369_s1 = inlined_call_operand.hbm [shape: f32[64,64], index: 1, kind: input, shape index: {}]   ;;  %s2370_s2 = inlined_call_operand.hbm [shape: f32[16,1], index: 2, kind: input, shape index: {}]   ;;  %s2371_s3 = inlined_call_operand.hbm [shape: f32[16,1], index: 3, kind: input, shape index: {}]   ;;  %s2372_s4 = inlined_call_operand.hbm [shape: bf16[3,32,64], index: 4, kind: input, shape index: {}]   ;;  %s2373_s5 = inlined_call_operand.hbm [shape: bf16[3,64,64], index: 5, kind: input, shape index: {}]   ;;  %s2374_s6 = inlined_call_operand.hbm [shape: f32[1,8], index: 6, kind: input, shape index: {}]   ;;  %s2375_s7 = inlined_call_operand.hbm [shape: f32[1,8], index: 7, kind: input, shape index: {}]   ;;  %s2376_s8 = inlined_call_operand.hbm [shape: f32[1,8], index: 8, kind: input, shape index: {}]   ;;  %s2377_s9 = inlined_call_operand.hbm [shape: f32[1,8], index: 9, kind: input, shape index: {}]   ;;  %s2378_s10 = inlined_call_operand.hbm [shape: f32[64,8], index: 10, kind: input, shape index: {}]   ;;  %s2379_s11 = inlined_call_operand.hbm [shape: f32[8,64], index: 11, kind: input, shape index: {}]   ;;  %s2380_s12 = inlined_call_operand.hbm [shape: f32[16,64], index: 12, kind: output, shape index: {}]  }
   0x1   :  { %18 = vsyncpa [#allocation6], 0 }
   0x2   :  { %19 = vsyncpa [#allocation9], 0 }
   0x3   :  { %20 = vsyncpa [#allocation12], 0 }
   0x4   :  { %21 = vsyncpa [#allocation15], 0 }
   0x5   :  { %22 = vsyncpa [#allocation18], 0 }
   0x6   :  { %23 = vsyncpa [#allocation21], 0 }
   0x7   :  { %24 = vsyncpa [#allocation4], 0  ;;  %s1889_s21 = smov [#allocation5]   ;;  %s1890_s23 = smov [#allocation8]  }
   0x8   :  { %s42_s22 = sshll.u32 %s1889_s21, 4  ;;  %s66_s24 = sshll.u32 %s1890_s23, 4  ;;  %s43_s22 = int_to_ptr.vmem [resolvable:$true] %s42_s22  ;;  %s1977_s24 = int_to_ptr.vmem [resolvable:$true] %s66_s24 }
   0x9   :  { %s1587_s27 = scalar_lea.hbm %s2369_s1, 1024 }
   0xa   :  { %p1588_p0 = scmp.ne.s32.totalorder %s2369_s1, %s1587_s27  ;;  %p1591_p1 = scmp.lt.u32.totalorder %s1587_s27, %s2369_s1 }
   0xc   :  { %p1593_p2 = pnand %p1591_p1, %p1588_p0 }
   0xe   :  { %1596 = shalt.err (!%p1593_p2)
}
   0xf   :  { %s1597_s14 = scalar_lea.vmem %s43_s22, 1024  ;;  %p1602_p4 = scmp.lt.s32.totalorder %s43_s22, %s43_s22 }
  0x10   :  { %p1598_p3 = scmp.ne.s32.totalorder %s43_s22, %s1597_s14  ;;  %p1603_p5 = scmp.lt.s32.totalorder %s1597_s14, %s1597_s14 }
  0x12   :  { %p1604_p6 = por %p1603_p5, %p1602_p4 }
  0x14   :  { %p1605_p7 = pnand %p1604_p6, %p1598_p3 }
  0x16   :  { %1608 = shalt.err (!%p1605_p7)
}
  0x17   :  { %s1891_s15 = smov 128   ;;  %s1892_s16 = smov 8  }
  0x18   :  { %48 = dma.hbm_to_vmem [thread:$0]  %s2369_s1, 1024, %s43_s22, [#allocation6], %s1891_s15, %s1891_s15, %s1892_s16  }
  0x19   :  { %s1609_s21 = scalar_lea.hbm %s2371_s3, 256 }
  0x1a   :  { %p1610_p8 = scmp.ne.s32.totalorder %s2371_s3, %s1609_s21  ;;  %p1613_p9 = scmp.lt.u32.totalorder %s1609_s21, %s2371_s3 }
  0x1c   :  { %p1615_p10 = pnand %p1613_p9, %p1610_p8 }
  0x1e   :  { %1618 = shalt.err (!%p1615_p10)
}
  0x1f   :  { %s1619_s28 = scalar_lea.vmem %s1977_s24, 256  ;;  %p1624_p12 = scmp.lt.s32.totalorder %s1977_s24, %s1977_s24 }
  0x20   :  { %p1620_p11 = scmp.ne.s32.totalorder %s1977_s24, %s1619_s28  ;;  %p1625_p13 = scmp.lt.s32.totalorder %s1619_s28, %s1619_s28 }
  0x22   :  { %p1626_p0 = por %p1625_p13, %p1624_p12 }
  0x24   :  { %p1627_p1 = pnand %p1626_p0, %p1620_p11 }
  0x26   :  { %1630 = shalt.err (!%p1627_p1)
}
  0x27   :  { %72 = dma.hbm_to_vmem [thread:$0]  %s2371_s3, 256, %s1977_s24, [#allocation9], %s1891_s15, %s1891_s15, %s1892_s16  }
  0x28   :  { %s1893_s29 = smov [#allocation11]   ;;  %s1894_s13 = smov [#allocation14]  }
  0x29   :  { %s90_s30 = sshll.u32 %s1893_s29, 4  ;;  %s113_s14 = sshll.u32 %s1894_s13, 4  ;;  %s91_s30 = int_to_ptr.vmem [resolvable:$true] %s90_s30  ;;  %s2014_s14 = int_to_ptr.vmem [resolvable:$true] %s113_s14 }
  0x2a   :  { %s1631_s19 = scalar_lea.hbm %s2373_s5, 1536 }
  0x2b   :  { %p1632_p2 = scmp.ne.s32.totalorder %s2373_s5, %s1631_s19  ;;  %p1635_p3 = scmp.lt.u32.totalorder %s1631_s19, %s2373_s5 }
  0x2d   :  { %p1637_p4 = pnand %p1635_p3, %p1632_p2 }
  0x2f   :  { %1640 = shalt.err (!%p1637_p4)
}
  0x30   :  { %s1641_s3 = scalar_lea.vmem %s91_s30, 1536  ;;  %p1646_p6 = scmp.lt.s32.totalorder %s91_s30, %s91_s30 }
  0x31   :  { %p1642_p5 = scmp.ne.s32.totalorder %s91_s30, %s1641_s3  ;;  %p1647_p7 = scmp.lt.s32.totalorder %s1641_s3, %s1641_s3 }
  0x33   :  { %p1648_p8 = por %p1647_p7, %p1646_p6 }
  0x35   :  { %p1649_p9 = pnand %p1648_p8, %p1642_p5 }
  0x37   :  { %1652 = shalt.err (!%p1649_p9)
}
  0x38   :  { %s1895_s24 = smov 64   ;;  %s1896_s26 = smov 4  }
  0x39   :  { %96 = dma.hbm_to_vmem [thread:$0]  %s2373_s5, 1536, %s91_s30, [#allocation12], %s1895_s24, %s1895_s24, %s1896_s26  }
  0x3a   :  { %s1653_s29 = scalar_lea.hbm %s2375_s7, 16 }
  0x3b   :  { %p1654_p10 = scmp.ne.s32.totalorder %s2375_s7, %s1653_s29  ;;  %p1657_p11 = scmp.lt.u32.totalorder %s1653_s29, %s2375_s7 }
  0x3d   :  { %p1659_p12 = pnand %p1657_p11, %p1654_p10 }
  0x3f   :  { %1662 = shalt.err (!%p1659_p12)
}
  0x40   :  { %s1663_s20 = scalar_lea.vmem %s2014_s14, 16  ;;  %s1667_s5 = scalar_lea.vmem %s2014_s14, 32 }
  0x41   :  { %p1664_p13 = scmp.ne.s32.totalorder %s2014_s14, %s1663_s20  ;;  %p1668_p0 = scmp.lt.s32.totalorder %s2014_s14, %s2014_s14 }
  0x42   :  { %p1669_p1 = scmp.lt.s32.totalorder %s1667_s5, %s1663_s20 }
  0x44   :  { %p1670_p2 = por %p1669_p1, %p1668_p0 }
  0x46   :  { %p1671_p3 = pnand %p1670_p2, %p1664_p13 }
  0x48   :  { %1674 = shalt.err (!%p1671_p3)
}
  0x49   :  { %116 = dma.hbm_to_vmem [thread:$0]  %s2375_s7, 16, %s2014_s14, [#allocation15]  }
  0x4a   :  { %s1897_s23 = smov [#allocation17]   ;;  %s1898_s3 = smov [#allocation2]  }
  0x4b   :  { %s133_s25 = sshll.u32 %s1897_s23, 4  ;;  %s30_s27 = sshll.u32 %s1898_s3, 4  ;;  %s134_s25 = int_to_ptr.vmem [resolvable:$true] %s133_s25  ;;  %s2049_s27 = int_to_ptr.vmem [resolvable:$true] %s30_s27 }
  0x4c   :  { %s1675_s22 = scalar_lea.hbm %s2377_s9, 16 }
  0x4d   :  { %p1676_p4 = scmp.ne.s32.totalorder %s2377_s9, %s1675_s22  ;;  %p1679_p5 = scmp.lt.u32.totalorder %s1675_s22, %s2377_s9 }
  0x4f   :  { %p1681_p6 = pnand %p1679_p5, %p1676_p4 }
  0x51   :  { %1684 = shalt.err (!%p1681_p6)
}
  0x52   :  { %s1685_s7 = scalar_lea.vmem %s134_s25, 16  ;;  %s1689_s14 = scalar_lea.vmem %s134_s25, 32 }
  0x53   :  { %p1686_p7 = scmp.ne.s32.totalorder %s134_s25, %s1685_s7  ;;  %p1690_p8 = scmp.lt.s32.totalorder %s134_s25, %s134_s25 }
  0x54   :  { %p1691_p9 = scmp.lt.s32.totalorder %s1689_s14, %s1685_s7 }
  0x56   :  { %p1692_p10 = por %p1691_p9, %p1690_p8 }
  0x58   :  { %p1693_p11 = pnand %p1692_p10, %p1686_p7 }
  0x5a   :  { %1696 = shalt.err (!%p1693_p11)
}
  0x5b   :  { %136 = dma.hbm_to_vmem [thread:$0]  %s2377_s9, 16, %s134_s25, [#allocation18]  }
  0x5c   :  { %s1697_s21 = scalar_lea.hbm %s2368_s0, 256 }
  0x5d   :  { %p1698_p12 = scmp.ne.s32.totalorder %s2368_s0, %s1697_s21  ;;  %p1701_p13 = scmp.lt.u32.totalorder %s1697_s21, %s2368_s0 }
  0x5f   :  { %p1703_p0 = pnand %p1701_p13, %p1698_p12 }
  0x61   :  { %1706 = shalt.err (!%p1703_p0)
}
  0x62   :  { %s1707_s22 = scalar_lea.vmem %s2049_s27, 256  ;;  %p1712_p2 = scmp.lt.s32.totalorder %s2049_s27, %s2049_s27 }
  0x63   :  { %p1708_p1 = scmp.ne.s32.totalorder %s2049_s27, %s1707_s22  ;;  %p1713_p3 = scmp.lt.s32.totalorder %s1707_s22, %s1707_s22 }
  0x65   :  { %p1714_p4 = por %p1713_p3, %p1712_p2 }
  0x67   :  { %p1715_p5 = pnand %p1714_p4, %p1708_p1 }
  0x69   :  { %1718 = shalt.err (!%p1715_p5)
}
  0x6a   :  { %36 = dma.hbm_to_vmem [thread:$0]  %s2368_s0, 256, %s2049_s27, [#allocation3], %s1891_s15, %s1891_s15, %s1892_s16  }
  0x6b   :  { %s1899_s29 = smov [#allocation7]   ;;  %s1900_s17 = smov [#allocation10]  }
  0x6c   :  { %s54_s13 = sshll.u32 %s1899_s29, 4  ;;  %s78_s18 = sshll.u32 %s1900_s17, 4  ;;  %s55_s13 = int_to_ptr.vmem [resolvable:$true] %s54_s13  ;;  %s2083_s18 = int_to_ptr.vmem [resolvable:$true] %s78_s18 }
  0x6d   :  { %s1719_s19 = scalar_lea.hbm %s2370_s2, 256 }
  0x6e   :  { %p1720_p6 = scmp.ne.s32.totalorder %s2370_s2, %s1719_s19  ;;  %p1723_p7 = scmp.lt.u32.totalorder %s1719_s19, %s2370_s2 }
  0x70   :  { %p1725_p8 = pnand %p1723_p7, %p1720_p6 }
  0x72   :  { %1728 = shalt.err (!%p1725_p8)
}
  0x73   :  { %s1729_s0 = scalar_lea.vmem %s55_s13, 256  ;;  %p1734_p10 = scmp.lt.s32.totalorder %s55_s13, %s55_s13 }
  0x74   :  { %p1730_p9 = scmp.ne.s32.totalorder %s55_s13, %s1729_s0  ;;  %p1735_p11 = scmp.lt.s32.totalorder %s1729_s0, %s1729_s0 }
  0x76   :  { %p1736_p12 = por %p1735_p11, %p1734_p10 }
  0x78   :  { %p1737_p13 = pnand %p1736_p12, %p1730_p9 }
  0x7a   :  { %1740 = shalt.err (!%p1737_p13)
}
  0x7b   :  { %60 = dma.hbm_to_vmem [thread:$0]  %s2370_s2, 256, %s55_s13, [#allocation6], %s1891_s15, %s1891_s15, %s1892_s16  }
  0x7c   :  { %s1741_s1 = scalar_lea.hbm %s2372_s4, 768 }
  0x7d   :  { %p1742_p0 = scmp.ne.s32.totalorder %s2372_s4, %s1741_s1  ;;  %p1745_p1 = scmp.lt.u32.totalorder %s1741_s1, %s2372_s4 }
  0x7f   :  { %p1747_p2 = pnand %p1745_p1, %p1742_p0 }
  0x81   :  { %1750 = shalt.err (!%p1747_p2)
}
  0x82   :  { %s1751_s17 = scalar_lea.vmem %s2083_s18, 768  ;;  %p1756_p4 = scmp.lt.s32.totalorder %s2083_s18, %s2083_s18 }
  0x83   :  { %p1752_p3 = scmp.ne.s32.totalorder %s2083_s18, %s1751_s17  ;;  %p1757_p5 = scmp.lt.s32.totalorder %s1751_s17, %s1751_s17 }
  0x85   :  { %p1758_p6 = por %p1757_p5, %p1756_p4 }
  0x87   :  { %p1759_p7 = pnand %p1758_p6, %p1752_p3 }
  0x89   :  { %1762 = shalt.err (!%p1759_p7)
}
  0x8a   :  { %84 = dma.hbm_to_vmem [thread:$0]  %s2372_s4, 768, %s2083_s18, [#allocation9], %s1895_s24, %s1895_s24, %s1896_s26  }
  0x8b   :  { %s1901_s7 = smov [#allocation13]   ;;  %s1902_s19 = smov [#allocation16]  }
  0x8c   :  { %s103_s14 = sshll.u32 %s1901_s7, 4  ;;  %s123_s20 = sshll.u32 %s1902_s19, 4  ;;  %s104_s14 = int_to_ptr.vmem [resolvable:$true] %s103_s14  ;;  %s124_s20 = int_to_ptr.vmem [resolvable:$true] %s123_s20 }
  0x8d   :  { %s1763_s21 = scalar_lea.hbm %s2374_s6, 16 }
  0x8e   :  { %p1764_p8 = scmp.ne.s32.totalorder %s2374_s6, %s1763_s21  ;;  %p1767_p9 = scmp.lt.u32.totalorder %s1763_s21, %s2374_s6 }
  0x90   :  { %p1769_p10 = pnand %p1767_p9, %p1764_p8 }
  0x92   :  { %1772 = shalt.err (!%p1769_p10)
}
  0x93   :  { %s1773_s4 = scalar_lea.vmem %s104_s14, 16  ;;  %s1777_s26 = scalar_lea.vmem %s104_s14, 32 }
  0x94   :  { %p1774_p11 = scmp.ne.s32.totalorder %s104_s14, %s1773_s4  ;;  %p1778_p12 = scmp.lt.s32.totalorder %s104_s14, %s104_s14 }
  0x95   :  { %p1779_p13 = scmp.lt.s32.totalorder %s1777_s26, %s1773_s4 }
  0x97   :  { %p1780_p0 = por %p1779_p13, %p1778_p12 }
  0x99   :  { %p1781_p1 = pnand %p1780_p0, %p1774_p11 }
  0x9b   :  { %1784 = shalt.err (!%p1781_p1)
}
  0x9c   :  { %106 = dma.hbm_to_vmem [thread:$0]  %s2374_s6, 16, %s104_s14, [#allocation12]  }
  0x9d   :  { %s1785_s9 = scalar_lea.hbm %s2376_s8, 16 }
  0x9e   :  { %p1786_p2 = scmp.ne.s32.totalorder %s2376_s8, %s1785_s9  ;;  %p1789_p3 = scmp.lt.u32.totalorder %s1785_s9, %s2376_s8 }
  0xa0   :  { %p1791_p4 = pnand %p1789_p3, %p1786_p2 }
  0xa2   :  { %1794 = shalt.err (!%p1791_p4)
}
  0xa3   :  { %s1795_s13 = scalar_lea.vmem %s124_s20, 16  ;;  %s1799_s7 = scalar_lea.vmem %s124_s20, 32 }
  0xa4   :  { %p1796_p5 = scmp.ne.s32.totalorder %s124_s20, %s1795_s13  ;;  %p1800_p6 = scmp.lt.s32.totalorder %s124_s20, %s124_s20 }
  0xa5   :  { %p1801_p7 = scmp.lt.s32.totalorder %s1799_s7, %s1795_s13 }
  0xa7   :  { %p1802_p8 = por %p1801_p7, %p1800_p6 }
  0xa9   :  { %p1803_p9 = pnand %p1802_p8, %p1796_p5 }
  0xab   :  { %1806 = shalt.err (!%p1803_p9)
}
  0xac   :  { %126 = dma.hbm_to_vmem [thread:$0]  %s2376_s8, 16, %s124_s20, [#allocation15]  }
  0xad   :  { %s1903_s19 = smov [#allocation19]   ;;  %s1904_s30 = smov [#allocation20]  }
  0xae   :  { %s142_s5 = sshll.u32 %s1903_s19, 4  ;;  %s155_s21 = sshll.u32 %s1904_s30, 4  ;;  %s143_s5 = int_to_ptr.vmem [resolvable:$true] %s142_s5  ;;  %s156_s21 = int_to_ptr.vmem [resolvable:$true] %s155_s21 }
  0xaf   :  { %s1807_s23 = scalar_lea.hbm %s2378_s10, 1024 }
  0xb0   :  { %p1808_p10 = scmp.ne.s32.totalorder %s2378_s10, %s1807_s23  ;;  %p1811_p11 = scmp.lt.u32.totalorder %s1807_s23, %s2378_s10 }
  0xb2   :  { %p1813_p12 = pnand %p1811_p11, %p1808_p10 }
  0xb4   :  { %1816 = shalt.err (!%p1813_p12)
}
  0xb5   :  { %s1817_s8 = scalar_lea.vmem %s143_s5, 1024  ;;  %p1822_p0 = scmp.lt.s32.totalorder %s143_s5, %s143_s5 }
  0xb6   :  { %p1818_p13 = scmp.ne.s32.totalorder %s143_s5, %s1817_s8  ;;  %p1823_p1 = scmp.lt.s32.totalorder %s1817_s8, %s1817_s8 }
  0xb8   :  { %p1824_p2 = por %p1823_p1, %p1822_p0 }
  0xba   :  { %p1825_p3 = pnand %p1824_p2, %p1818_p13 }
  0xbc   :  { %1828 = shalt.err (!%p1825_p3)
}
  0xbd   :  { %148 = dma.hbm_to_vmem [thread:$0]  %s2378_s10, 1024, %s143_s5, [#allocation18], %s1891_s15, %s1891_s15, %s1892_s16  }
  0xbe   :  { %s1829_s9 = scalar_lea.hbm %s2379_s11, 128 }
  0xbf   :  { %p1830_p4 = scmp.ne.s32.totalorder %s2379_s11, %s1829_s9  ;;  %p1833_p5 = scmp.lt.u32.totalorder %s1829_s9, %s2379_s11 }
  0xc1   :  { %p1835_p6 = pnand %p1833_p5, %p1830_p4 }
  0xc3   :  { %1838 = shalt.err (!%p1835_p6)
}
  0xc4   :  { %s1839_s13 = scalar_lea.vmem %s156_s21, 128  ;;  %p1844_p8 = scmp.lt.s32.totalorder %s156_s21, %s156_s21 }
  0xc5   :  { %p1840_p7 = scmp.ne.s32.totalorder %s156_s21, %s1839_s13  ;;  %p1845_p9 = scmp.lt.s32.totalorder %s1839_s13, %s1839_s13 }
  0xc7   :  { %p1846_p10 = por %p1845_p9, %p1844_p8 }
  0xc9   :  { %p1847_p11 = pnand %p1846_p10, %p1840_p7 }
  0xcb   :  { %1850 = shalt.err (!%p1847_p11)
}
  0xcc   :  { %158 = dma.hbm_to_vmem [thread:$0]  %s2379_s11, 128, %s156_s21, [#allocation21]  }
  0xcd   :  { %1873 = dma.done.wait [#allocation3], 256  }
  0xce   :  { %1874 = vsyncadd [#allocation3], 4294967040 }
  0xcf   :  { %1875 = dma.done.wait [#allocation6], 1280  }
  0xd0   :  { %1876 = vsyncadd [#allocation6], 4294966016 }
  0xd1   :  { %1877 = dma.done.wait [#allocation9], 1024  }
  0xd2   :  { %1878 = vsyncadd [#allocation9], 4294966272 }
  0xd3   :  { %1879 = dma.done.wait [#allocation12], 1552  }
  0xd4   :  { %1880 = vsyncadd [#allocation12], 4294965744 }
  0xd5   :  { %1881 = dma.done.wait [#allocation15], 32  }
  0xd6   :  { %1882 = vsyncadd [#allocation15], 4294967264 }
  0xd7   :  { %1883 = dma.done.wait [#allocation18], 1040  }
  0xd8   :  { %1884 = vsyncadd [#allocation18], 4294966256 }
  0xd9   :  { %1885 = dma.done.wait [#allocation21], 128  }
  0xda   :  { %1886 = vsyncadd [#allocation21], 4294967168  ;;  %v1905_v0 = vmov 0   ;;  %v200_v1 = vld [vmem:[#allocation2] sm:$0xff]  ;;  %v212_v2 = vld [vmem:[#allocation5] sm:$0xff]  ;;  %vm220_vm0 = vcmask 523264   ;;  %v315_v28 = vlaneseq }
  0xdb   :  { %1563 = vset.pattern.permute.xlu0 %v1905_v0  ;;  %1564 = vset.pattern.permute.xlu1 %v1905_v0  ;;  %v213_v3 = vld [vmem:[#allocation5 + $0x8] sm:$0xff]  ;;  %v214_v4 = vld [vmem:[#allocation5 + $0x10] sm:$0xff]  ;;  %v215_v5 = vld [vmem:[#allocation5 + $0x18] sm:$0xff]  ;;  %v1906_v22 = vmov 0.0   ;;  %vm1907_vm1 = vmmov 0   ;;  %s1908_s11 = smov 96  }
  0xdc   :  { %204 = vrot.lane.b32.xlu0 %v200_v1, %s1895_s24  ;;  %v201_v6 = vld [vmem:[#allocation2 + $0x8] sm:$0xff]  ;;  %v1484_v7 = vpack.c.bf16 %v213_v3, %v212_v2  ;;  %v1488_v8 = vpack.c.bf16 %v215_v5, %v214_v4  ;;  %v216_v9 = vld [vmem:[#allocation5 + $0x20] sm:$0xff]  ;;  %v217_v10 = vld [vmem:[#allocation5 + $0x28] sm:$0xff]  ;;  %1416 = vmatprep.mubr.msk.f32.mxu0 %vm1907_vm1, %v1906_v22  ;;  %v2182_v31 = vshrl.u32 %v315_v28, 7  ;;  %vm372_vm3 = vcmask 261120  }
  0xdd   :  { %v196_v11 = vld [vmem:[#allocation7] sm:$0xff]  ;;  %v218_v12 = vld [vmem:[#allocation5 + $0x30] sm:$0xff]  ;;  %v219_v13 = vld [vmem:[#allocation5 + $0x38] sm:$0xff]  ;;  %v1492_v14 = vpack.c.bf16 %v217_v10, %v216_v9  ;;  %v1909_v60 = vmov 0.0|0.0   ;;  %vm684_vm6 = vcmask 64512  }
  0xde   :  { %1485 = vmatprep.subr.bf16.mxu1 %v1484_v7  ;;  %v199_v15 = vld [vmem:[#allocation8 + $0x8] sm:$0xff]  ;;  %v1496_v16 = vpack.c.bf16 %v219_v13, %v218_v12  ;;  %v1565_v21 = vld [vmem:[#allocation10 + $0x10] sm:$0xff]   ;;  %v197_v26 = vld [vmem:[#allocation7 + $0x8] sm:$0xff]  ;;  %vm317_vm2 = vcmp.lt.s32.totalorder %v2182_v31, 1  ;;  %vm335_vm4 = vcmp.lt.s32.totalorder %v2182_v31, 7  ;;  %1500 = vmatprep.subr.bf16.mxu0 %v1909_v60  ;;  %vm556_vm5 = vcmp.eq.s32.totalorder %v2182_v31, 0 }
  0xdf   :  { %1487 = vmatpush3.bf16.msra.mxu1 %v1484_v7  ;;  %v1566_v23 = vld [vmem:[#allocation10 + $0x18] sm:$0xff]   ;;  %v198_v27 = vld [vmem:[#allocation8] sm:$0xff]  ;;  %v1567_v35 = vld [vmem:[#allocation10] sm:$0xff]  }
  0xe0   :  { %206 = vrot.lane.b32.xlu0 %v201_v6, %s1895_s24  ;;  %1489 = vmatprep.subr.bf16.mxu1 %v1488_v8  ;;  %v1568_v44 = vld [vmem:[#allocation10 + $0x8] sm:$0xff]   ;;  %v1569_v50 = vld [vmem:[#allocation10 + $0x20] sm:$0xff]   ;;  %v558_v57 = vld [vmem:[#allocation19] sm:$0xff]  ;;  %s1911_s24 = smov [#allocation22]  }
  0xe1   :  { %v1570_v55 = vld [vmem:[#allocation10 + $0x28] sm:$0xff]   ;;  %v559_v58 = vld [vmem:[#allocation19 + $0x8] sm:$0xff]  ;;  %v561_v62 = vld [vmem:[#allocation19 + $0x18] sm:$0xff]  ;;  %s1253_s6 = sshll.u32 %s1911_s24, 4  ;;  %s1254_s6 = int_to_ptr.vmem [resolvable:$true] %s1253_s6 }
  0xe2   :  { %v2219_v59 = vpack.c.bf16 %v559_v58, %v558_v57  ;;  %v560_v61 = vld [vmem:[#allocation19 + $0x10] sm:$0xff]  ;;  %v562_v0 = vld [vmem:[#allocation19 + $0x20] sm:$0xff]  ;;  %v565_v4 = vld [vmem:[#allocation19 + $0x38] sm:$0xff]  ;;  %s1851_s14 = scalar_lea.vmem %s1254_s6, 256  ;;  %p1856_p13 = scmp.lt.s32.totalorder %s1254_s6, %s1254_s6 }
  0xe3   :  { %1491 = vmatpush3.bf16.msra.mxu1 %v1488_v8  ;;  %v2224_v63 = vpack.c.bf16 %v561_v62, %v560_v61  ;;  %v564_v3 = vld [vmem:[#allocation19 + $0x30] sm:$0xff]  ;;  %v667_v58 = vld [vmem:[#allocation14] sm:$0x1]  ;;  %v2268_v62 = vsub.s32 0, %v2182_v31  ;;  %p1852_p12 = scmp.ne.s32.totalorder %s1254_s6, %s1851_s14  ;;  %p1857_p0 = scmp.lt.s32.totalorder %s1851_s14, %s1851_s14 }
  0xe4   :  { %322 = vperm.xlu0 %1563, %v196_v11   ;;  %1493 = vmatprep.subr.bf16.mxu1 %v1492_v14  ;;  %v2231_v5 = vpack.c.bf16 %v565_v4, %v564_v3 }
  0xe5   :  { %1502 = vmatpush3.bf16.msra.mxu0 %v2219_v59  ;;  %p1858_p1 = por %p1857_p0, %p1856_p13 }
  0xe6   :  { %1503 = vmatprep.subr.bf16.mxu0 %v1909_v60 }
  0xe7   :  { %1495 = vmatpush3.bf16.msra.mxu1 %v1492_v14  ;;  %p1859_p2 = pnand %p1858_p1, %p1852_p12 }
  0xe8   :  { %345 = vperm.xlu0 %1563, %v199_v15   ;;  %1497 = vmatprep.subr.bf16.mxu1 %v1496_v16 }
  0xe9   :  { %1505 = vmatpush3.bf16.msra.mxu0 %v2224_v63 }
  0xea   :  { %1506 = vmatprep.subr.bf16.mxu0 %v1909_v60 }
  0xeb   :  { %1499 = vmatpush3.bf16.msra.mxu1 %v1496_v16 }
  0xec   :  { %1376 = vmatprep.subr.bf16.mxu1 %v1906_v22 }
 0x14e   :  { %v205_v17 = vpop.permute.xlu0 %204 }
 0x14f   :  { %v210_v18 = vmax.f32 %v200_v1, %v205_v17  ;;  %v563_v1 = vld [vmem:[#allocation19 + $0x28] sm:$0xff] }
 0x150   :  { %v2228_v2 = vpack.c.bf16 %v563_v1, %v562_v0 }
 0x151   :  { %1373 = vmatprep.mubr.msk.f32.mxu1 %vm220_vm0, %v210_v18 }
 0x152   :  { %v207_v19 = vpop.permute.xlu0 %206  ;;  %1508 = vmatpush3.bf16.msra.mxu0 %v2228_v2 }
 0x153   :  { %v211_v20 = vmax.f32 %v201_v6, %v207_v19  ;;  %1509 = vmatprep.subr.bf16.mxu0 %v1909_v60 }
 0x155   :  { %1374 = vmatmul.mubr.msk.f32.vlgmr.msra.gmra.mrb[0].mxu1 %vm220_vm0, %v211_v20 }
 0x156   :  { %1377 = vmatpush3.bf16.msra.mxu1 %v1565_v21  ;;  %1380 = vmatprep.mubr.msk.bf16.mxu1 %vm1907_vm1, %v1906_v22 }
 0x157   :  { %1378 = vmatprep.subr.bf16.mxu1 %v1906_v22  ;;  %1511 = vmatpush3.bf16.msra.mxu0 %v2231_v5 }
 0x158   :  { %1424 = vmatprep.subr.bf16.mxu0 %v1906_v22 }
 0x15a   :  { %1379 = vmatpush3.bf16.msra.mxu1 %v1566_v23 }
 0x15b   :  { %1384 = vmatprep.subr.bf16.mxu1 %v1906_v22 }
 0x163   :  { %v2199_v45 = vpop.permute.xlu0 %322 }
 0x167   :  { %v2205_v49 = vpop.permute.xlu0 %345 }
 0x228   :  { %v1375_v24 = vpop.f32.mrb[0].mxu1 }
 0x229   :  { %v293_v25 = vpop.f32.mrb[1].mxu1 }
 0x22a   :  { %304 = vrot.lane.b32.xlu1 %v293_v25, %s1908_s11 }
 0x22e   :  { %306 = vrot.lane.b32.xlu1 %v1375_v24, %s1908_s11 }
 0x232   :  { %327 = vperm.xlu1 %1564, %v197_v26  }
 0x236   :  { %340 = vperm.xlu1 %1564, %v198_v27  }
 0x29c   :  { %v305_v29 = vpop.permute.xlu1 %304 }
 0x29d   :  { %v310_v30 = vmax.f32 %v293_v25, %v305_v29 }
 0x29f   :  { %v313_v34 = vrot.slane %v310_v30, 7  ;;  %v333_v36 = vrot.slane %v310_v30, 1 }
 0x2a0   :  { %v307_v32 = vpop.permute.xlu1 %306 }
 0x2a1   :  { %v311_v33 = vmax.f32 %v1375_v24, %v307_v32 }
 0x2a3   :  { %v312_v37 = vpack.c.bf16 %v311_v33, %v310_v30  ;;  %v314_v38 = vrot.slane %v311_v33, 7  ;;  %v334_v39 = vrot.slane %v311_v33, 1  ;;  %v2256_v33 = vld [vmem:[#allocation20] sm:$0xff] }
 0x2a5   :  { %v319_v40 = vsel %vm317_vm2, %v314_v38, %v313_v34  ;;  %1381 = vmatmul.mubr.msk.bf16.vlgmr.msra.gmra.mrb[4].mxu1 %vm372_vm3, %v312_v37  ;;  %v337_v41 = vsel %vm335_vm4, %v334_v39, %v333_v36  ;;  %v318_v42 = vsel %vm317_vm2, %v313_v34, %v314_v38  ;;  %v336_v43 = vsel %vm335_vm4, %v333_v36, %v334_v39  ;;  %v1571_v34 = vld [vmem:[#allocation11 + $0x20] sm:$0xff]  }
 0x2a6   :  { %1385 = vmatpush3.bf16.msra.mxu1 %v1567_v35  ;;  %1388 = vmatprep.mubr.msk.bf16.mxu1 %vm1907_vm1, %v1906_v22  ;;  %v330_v47 = vmul.f32 %v2199_v45, %v319_v40  ;;  %v349_v53 = vmul.f32 %v2205_v49, %v337_v41  ;;  %v1572_v35 = vld [vmem:[#allocation11 + $0x28] sm:$0xff]  }
 0x2a7   :  { %1386 = vmatprep.subr.bf16.mxu1 %v1906_v22 }
 0x2aa   :  { %1387 = vmatpush3.bf16.msra.mxu1 %v1568_v44  ;;  %v1910_v44 = vmov 1966171168  }
 0x2ab   :  { %1392 = vmatprep.subr.bf16.mxu1 %v1906_v22 }
 0x2b1   :  { %v2201_v46 = vpop.permute.xlu1 %327 }
 0x2b2   :  { %v331_v48 = vmul.f32 %v2201_v46, %v318_v42 }
 0x2b4   :  { %v332_v51 = vpack.c.bf16 %v331_v48, %v330_v47  ;;  %v651_v47 = vunpack.c.l.s4 %v1910_v44 }
 0x2b5   :  { %v2207_v52 = vpop.permute.xlu1 %340 }
 0x2b6   :  { %v348_v54 = vmul.f32 %v2207_v52, %v336_v43  ;;  %1389 = vmatmul.mubr.msk.bf16.vlgmr.msra.gmra.mrb[4].mxu1 %vm372_vm3, %v332_v51  ;;  %v652_v48 = vunpack.c.0.s8 %v651_v47 }
 0x2b7   :  { %1393 = vmatpush3.bf16.msra.mxu1 %v1569_v50  ;;  %1396 = vmatprep.mubr.msk.bf16.mxu1 %vm1907_vm1, %v1906_v22 }
 0x2b8   :  { %v350_v56 = vpack.c.bf16 %v349_v53, %v348_v54  ;;  %1394 = vmatprep.subr.bf16.mxu1 %v1906_v22  ;;  %v2263_v50 = vsub.s32 %v652_v48, %v2182_v31 }
 0x2bb   :  { %1395 = vmatpush3.bf16.msra.mxu1 %v1570_v55  ;;  %v646_v55 = vld [vmem:[#allocation13] sm:$0x1] }
 0x2bc   :  { %1419 = vmatprep.subr.mxu1 %v1906_v22 }
 0x2c2   :  { %1397 = vmatmul.mubr.msk.bf16.vlgmr.msra.gmra.mrb[4].mxu1 %vm372_vm3, %v350_v56 }
 0x2c3   :  { %1421 = vmatprep.mubr.msk.f32.mxu1 %vm1907_vm1, %v1906_v22  ;;  %1420 = vmatpush3.msra.mxu1 %v2256_v33 }
 0x2c4   :  { %1512 = vmatprep.subr.bf16.mxu1 %v1909_v60 }
 0x395   :  { %v2236_v6 = vpop.f32.mrb[4].mxu1 }
 0x396   :  { %v545_v7 = vmul.f32 %v2236_v6, %v2236_v6  ;;  %v1398_v8 = vpop.f32.mrb[5].mxu1  ;;  %v536_v10 = vsel %vm220_vm0, %v2236_v6, 0.0 }
 0x397   :  { %v2240_v9 = vpop.f32.mrb[6].mxu1 }
 0x398   :  { %v537_v11 = vsel %vm220_vm0, %v2240_v9, 0.0  ;;  %v546_v12 = vmul.f32 %v2240_v9, %v2240_v9  ;;  %v1399_v13 = vpop.f32.mrb[7].mxu1  ;;  %v547_v15 = vsel %vm220_vm0, %v545_v7, 0.0  ;;  %v1573_v7 = vld [vmem:[#allocation11 + $0x30] sm:$0xff]  }
 0x399   :  { %v538_v14 = vadd.f32 %v537_v11, %v536_v10 }
 0x39a   :  { %v548_v16 = vsel %vm220_vm0, %v546_v12, 0.0 }
 0x39b   :  { %v539_v17 = vrot.slane %v538_v14, 4  ;;  %v549_v18 = vadd.f32 %v548_v16, %v547_v15  ;;  %v1575_v16 = vld [vmem:[#allocation11] sm:$0xff]  }
 0x39d   :  { %v540_v19 = vadd.f32 %v539_v17, %v538_v14  ;;  %v550_v20 = vrot.slane %v549_v18, 4 }
 0x39f   :  { %v541_v21 = vrot.slane %v540_v19, 2  ;;  %v551_v23 = vadd.f32 %v550_v20, %v549_v18  ;;  %v1576_v18 = vld [vmem:[#allocation11 + $0x8] sm:$0xff]  }
 0x3a1   :  { %v542_v24 = vadd.f32 %v541_v21, %v540_v19  ;;  %v552_v25 = vrot.slane %v551_v23, 2  ;;  %v1577_v19 = vld [vmem:[#allocation11 + $0x10] sm:$0xff]  }
 0x3a3   :  { %v543_v26 = vrot.slane %v542_v24, 1  ;;  %v553_v27 = vadd.f32 %v552_v25, %v551_v23  ;;  %v1578_v23 = vld [vmem:[#allocation11 + $0x18] sm:$0xff]  }
 0x3a5   :  { %v554_v28 = vrot.slane %v553_v27, 1  ;;  %v544_v29 = vadd.f32 %v543_v26, %v542_v24  ;;  %v1579_v26 = vld [vmem:[#allocation11 + $0x40] sm:$0xff]  }
 0x3a7   :  { %v555_v30 = vadd.f32 %v554_v28, %v553_v27  ;;  %v1580_v28 = vld [vmem:[#allocation11 + $0x48] sm:$0xff]  }
 0x3a9   :  { %v557_v32 = vsel %vm556_vm5, %v544_v29, %v555_v30 }
 0x3aa   :  { %1417 = vmatmul.mubr.msk.f32.vlgmr.msra.gmra.mrb[0].mxu0 %vm220_vm0, %v557_v32 }
 0x3ab   :  { %1432 = vmatprep.mubr.msk.bf16.mxu0 %vm1907_vm1, %v1906_v22  ;;  %1425 = vmatpush3.bf16.msra.mxu0 %v1571_v34  ;;  %v1582_v34 = vld [vmem:[#allocation11 + $0x58] sm:$0xff]  }
 0x3ac   :  { %1426 = vmatprep.subr.bf16.mxu0 %v1906_v22 }
 0x3af   :  { %1427 = vmatpush3.bf16.msra.mxu0 %v1572_v35 }
 0x3b0   :  { %1428 = vmatprep.subr.bf16.mxu0 %v1906_v22 }
 0x3b3   :  { %1429 = vmatpush3.bf16.msra.mxu0 %v1573_v7 }
 0x3b4   :  { %1430 = vmatprep.subr.bf16.mxu0 %v1906_v22 }
 0x47d   :  { %v635_v36 = vpop.f32.mrb[0].mxu0 }
 0x47e   :  { %v639_v37 = vmul.f32 0.0078125, %v635_v36  ;;  %v1418_v38 = vpop.f32.mrb[1].mxu0 }
 0x480   :  { %v640_v39 = vmul.f32 %v639_v37, %v639_v37 }
 0x482   :  { %v642_v40 = vrot.slane %v640_v39, 7 }
 0x484   :  { %v644_v41 = vsub.f32 %v639_v37, %v642_v40 }
 0x486   :  { %v645_v42 = vmax.f32 %v644_v41, 0.0 }
 0x488   :  { %v647_v43 = vadd.f32 1e-05, %v645_v42 }
 0x48a   :  { %1583 = vrsqrt.f32 %v647_v43 }
 0x494   :  { %v1584_v51 = vpop.eup %1583 }
 0x495   :  { %v656_v53 = vrot.slane %v1584_v51, %v2263_v50 }
 0x497   :  { %v657_v54 = vcombine.high %v656_v53, %v656_v53 }
 0x499   :  { %v664_v56 = vrot.slane %v657_v54, %v2263_v50 }
 0x49b   :  { %v666_v57 = vmul.f32 %v664_v56, %v646_v55 }
 0x49d   :  { %v668_v61 = vmul.f32 %v666_v57, %v639_v37  ;;  %v674_v1 = vrot.slane %v666_v57, %v2268_v62 }
 0x49f   :  { %v669_v0 = vsub.f32 %v667_v58, %v668_v61 }
 0x4a1   :  { %v680_v3 = vrot.slane %v669_v0, %v2268_v62 }
 0x4a3   :  { %v682_v4 = vsel %vm556_vm5, %v674_v1, %v680_v3 }
 0x4a4   :  { %1422 = vmatmul.mubr.msk.f32.vlgmr.msra.gmra.mrb[2].mxu1 %vm684_vm6, %v682_v4 }
 0x4a5   :  { %1514 = vmatpush3.bf16.msra.mxu1 %v2219_v59  ;;  %1476 = vmatprep.mubr.msk.f32.mxu1 %vm1907_vm1, %v1906_v22  ;;  %v1574_v59 = vld [vmem:[#allocation11 + $0x38] sm:$0xff]  }
 0x4a6   :  { %1515 = vmatprep.subr.bf16.mxu1 %v1909_v60  ;;  %1431 = vmatpush3.bf16.msra.mxu0 %v1574_v59 }
 0x4a7   :  { %1436 = vmatprep.subr.bf16.mxu0 %v1906_v22 }
 0x4a9   :  { %1517 = vmatpush3.bf16.msra.mxu1 %v2224_v63  ;;  %v766_v63 = vsub.s32 1, %v2182_v31 }
 0x4aa   :  { %1518 = vmatprep.subr.bf16.mxu1 %v1909_v60 }
 0x4ad   :  { %1520 = vmatpush3.bf16.msra.mxu1 %v2228_v2 }
 0x4ae   :  { %1521 = vmatprep.subr.bf16.mxu1 %v1909_v60 }
 0x4b1   :  { %1523 = vmatpush3.bf16.msra.mxu1 %v2231_v5 }
 0x4b2   :  { %1479 = vmatprep.subr.mxu1 %v1906_v22 }
 0x577   :  { %v754_v8 = vpop.f32.mrb[2].mxu1 }
 0x578   :  { %v761_v10 = vrot.slane %v754_v8, %v2268_v62  ;;  %v1423_v2 = vpop.f32.mrb[3].mxu1  ;;  %v767_v11 = vrot.slane %v754_v8, %v766_v63 }
 0x57a   :  { %v762_v60 = vmul.f32 %v761_v10, %v2236_v6  ;;  %v763_v5 = vmul.f32 %v761_v10, %v2240_v9 }
 0x57c   :  { %v768_v12 = vadd.f32 %v767_v11, %v762_v60  ;;  %v769_v13 = vadd.f32 %v767_v11, %v763_v5 }
 0x57e   :  { %v2293_v14 = vmax.f32 %v768_v12, 0.0  ;;  %v2295_v15 = vmax.f32 %v769_v13, 0.0 }
 0x580   :  { %v772_v17 = vpack.c.bf16 %v2295_v15, %v2293_v14  ;;  %v773_v6 = vrot.slane %v2293_v14, 7  ;;  %v774_v9 = vrot.slane %v2295_v15, 7  ;;  %v780_v29 = vrot.slane %v2293_v14, 1 }
 0x582   :  { %1433 = vmatmul.mubr.msk.bf16.vlgmr.msra.gmra.mrb[4].mxu0 %vm220_vm0, %v772_v17  ;;  %v775_v20 = vsel %vm317_vm2, %v773_v6, %v774_v9  ;;  %v776_v21 = vsel %vm317_vm2, %v774_v9, %v773_v6  ;;  %v1120_v6 = vld [vmem:[#allocation16] sm:$0x1] }
 0x583   :  { %1437 = vmatpush3.bf16.msra.mxu0 %v1575_v16  ;;  %1444 = vmatprep.mubr.msk.bf16.mxu0 %vm1907_vm1, %v1906_v22  ;;  %v777_v24 = vmul.f32 %v776_v21, %v2199_v45  ;;  %v778_v25 = vmul.f32 %v775_v20, %v2201_v46  ;;  %v781_v45 = vrot.slane %v2295_v15, 1  ;;  %v1581_v46 = vld [vmem:[#allocation11 + $0x50] sm:$0xff]  }
 0x584   :  { %1438 = vmatprep.subr.bf16.mxu0 %v1906_v22 }
 0x585   :  { %v779_v27 = vpack.c.bf16 %v778_v25, %v777_v24  ;;  %v782_v30 = vsel %vm335_vm4, %v780_v29, %v781_v45  ;;  %v783_v32 = vsel %vm335_vm4, %v781_v45, %v780_v29 }
 0x586   :  { %v784_v35 = vmul.f32 %v782_v30, %v2207_v52  ;;  %v785_v36 = vmul.f32 %v783_v32, %v2205_v49 }
 0x587   :  { %1439 = vmatpush3.bf16.msra.mxu0 %v1576_v18 }
 0x588   :  { %1440 = vmatprep.subr.bf16.mxu0 %v1906_v22  ;;  %v786_v37 = vpack.c.bf16 %v785_v36, %v784_v35 }
 0x58b   :  { %1441 = vmatpush3.bf16.msra.mxu0 %v1577_v19  ;;  %v1141_v19 = vld [vmem:[#allocation17] sm:$0x1] }
 0x58c   :  { %1442 = vmatprep.subr.bf16.mxu0 %v1906_v22 }
 0x58f   :  { %1443 = vmatpush3.bf16.msra.mxu0 %v1578_v23 }
 0x590   :  { %1448 = vmatprep.subr.bf16.mxu0 %v1906_v22 }
 0x592   :  { %1445 = vmatmul.mubr.msk.bf16.vlgmr.msra.gmra.mrb[4].mxu0 %vm220_vm0, %v779_v27 }
 0x593   :  { %1449 = vmatpush3.bf16.msra.mxu0 %v1579_v26  ;;  %1456 = vmatprep.mubr.msk.bf16.mxu0 %vm1907_vm1, %v1906_v22 }
 0x594   :  { %1450 = vmatprep.subr.bf16.mxu0 %v1906_v22 }
 0x597   :  { %1451 = vmatpush3.bf16.msra.mxu0 %v1580_v28 }
 0x598   :  { %1452 = vmatprep.subr.bf16.mxu0 %v1906_v22 }
 0x59b   :  { %1453 = vmatpush3.bf16.msra.mxu0 %v1581_v46 }
 0x59c   :  { %1454 = vmatprep.subr.bf16.mxu0 %v1906_v22 }
 0x59f   :  { %1455 = vmatpush3.bf16.msra.mxu0 %v1582_v34 }
 0x5a2   :  { %1457 = vmatmul.mubr.msk.bf16.vlgmr.msra.gmra.mrb[4].mxu0 %vm220_vm0, %v786_v37 }
 0x675   :  { %v1010_v38 = vpop.f32.mrb[4].mxu0 }
 0x676   :  { %v1028_v39 = vmul.f32 %v1010_v38, %v1010_v38  ;;  %v1458_v40 = vpop.f32.mrb[5].mxu0  ;;  %v1019_v42 = vsel %vm220_vm0, %v1010_v38, 0.0 }
 0x677   :  { %v1013_v41 = vpop.f32.mrb[6].mxu0 }
 0x678   :  { %v1020_v43 = vsel %vm220_vm0, %v1013_v41, 0.0  ;;  %v1029_v44 = vmul.f32 %v1013_v41, %v1013_v41  ;;  %v1459_v47 = vpop.f32.mrb[7].mxu0  ;;  %v1030_v51 = vsel %vm220_vm0, %v1028_v39, 0.0 }
 0x679   :  { %v1021_v48 = vadd.f32 %v1020_v43, %v1019_v42 }
 0x67a   :  { %v1031_v52 = vsel %vm220_vm0, %v1029_v44, 0.0 }
 0x67b   :  { %v1022_v49 = vrot.slane %v1021_v48, 4  ;;  %v1032_v53 = vadd.f32 %v1031_v52, %v1030_v51 }
 0x67d   :  { %v1023_v54 = vadd.f32 %v1022_v49, %v1021_v48  ;;  %v1033_v55 = vrot.slane %v1032_v53, 4 }
 0x67f   :  { %v1024_v56 = vrot.slane %v1023_v54, 2  ;;  %v1034_v57 = vadd.f32 %v1033_v55, %v1032_v53 }
 0x681   :  { %v1025_v58 = vadd.f32 %v1024_v56, %v1023_v54  ;;  %v1035_v61 = vrot.slane %v1034_v57, 2 }
 0x683   :  { %v1026_v0 = vrot.slane %v1025_v58, 1  ;;  %v1036_v1 = vadd.f32 %v1035_v61, %v1034_v57 }
 0x685   :  { %v1037_v3 = vrot.slane %v1036_v1, 1  ;;  %v1027_v4 = vadd.f32 %v1026_v0, %v1025_v58 }
 0x687   :  { %v1038_v7 = vadd.f32 %v1037_v3, %v1036_v1 }
 0x689   :  { %v1039_v59 = vsel %vm556_vm5, %v1027_v4, %v1038_v7 }
 0x68a   :  { %1477 = vmatmul.mubr.msk.f32.vlgmr.msra.gmra.mrb[8].mxu1 %vm220_vm0, %v1039_v59 }
 0x68b   :  { %1480 = vmatpush3.msra.mxu1 %v2256_v33  ;;  %1481 = vmatprep.mubr.msk.f32.mxu1 %vm1907_vm1, %v1906_v22 }
 0x75d   :  { %v1109_v8 = vpop.f32.mrb[8].mxu1 }
 0x75e   :  { %v1113_v10 = vmul.f32 0.0078125, %v1109_v8  ;;  %v1478_v2 = vpop.f32.mrb[9].mxu1 }
 0x760   :  { %v1114_v60 = vmul.f32 %v1113_v10, %v1113_v10 }
 0x762   :  { %v1116_v5 = vrot.slane %v1114_v60, 7 }
 0x764   :  { %v1118_v11 = vsub.f32 %v1113_v10, %v1116_v5 }
 0x766   :  { %v1119_v12 = vmax.f32 %v1118_v11, 0.0 }
 0x768   :  { %v1121_v13 = vadd.f32 1e-05, %v1119_v12 }
 0x76a   :  { %1585 = vrsqrt.f32 %v1121_v13 }
 0x774   :  { %v1586_v16 = vpop.eup %1585 }
 0x775   :  { %v1130_v17 = vrot.slane %v1586_v16, %v2263_v50 }
 0x777   :  { %v1131_v18 = vcombine.high %v1130_v17, %v1130_v17 }
 0x779   :  { %v1138_v9 = vrot.slane %v1131_v18, %v2263_v50 }
 0x77b   :  { %v1140_v33 = vmul.f32 %v1138_v9, %v1120_v6 }
 0x77d   :  { %v1142_v20 = vmul.f32 %v1140_v33, %v1113_v10  ;;  %v1148_v21 = vrot.slane %v1140_v33, %v2268_v62 }
 0x77f   :  { %v1143_v22 = vsub.f32 %v1141_v19, %v1142_v20 }
 0x781   :  { %v1154_v23 = vrot.slane %v1143_v22, %v2268_v62 }
 0x783   :  { %v1156_v24 = vsel %vm556_vm5, %v1148_v21, %v1154_v23 }
 0x784   :  { %1482 = vmatmul.mubr.msk.f32.vlgmr.msra.gmra.mrb[10].mxu1 %vm684_vm6, %v1156_v24 }
 0x857   :  { %v1226_v25 = vpop.f32.mrb[10].mxu1 }
 0x858   :  { %v1233_v26 = vrot.slane %v1226_v25, %v2268_v62  ;;  %v1483_v27 = vpop.f32.mrb[11].mxu1  ;;  %v1239_v50 = vrot.slane %v1226_v25, %v766_v63 }
 0x85a   :  { %v1234_v28 = vmul.f32 %v1233_v26, %v1010_v38  ;;  %v1235_v29 = vmul.f32 %v1233_v26, %v1013_v41 }
 0x85c   :  { %v1240_v45 = vadd.f32 %v1239_v50, %v1234_v28  ;;  %v1241_v46 = vadd.f32 %v1239_v50, %v1235_v29 }
 0x85e   :  { %v1242_v30 = vadd.f32 %v1240_v45, %v2293_v14  ;;  %v1243_v32 = vadd.f32 %v1241_v46, %v2295_v15 }
 0x860   :  { %v1244_v34 = vmax.f32 %v1242_v30, 0.0  ;;  %v1245_v35 = vmax.f32 %v1243_v32, 0.0 }
 0x862   :  { %1246 = vst.msk [vmem:[#allocation22] sm:$0xff] %vm220_vm0, %v1244_v34  ;;  %1247 = vst.msk [vmem:[#allocation22 + $0x8] sm:$0xff] %vm220_vm0, %v1245_v35 }
 0x863   :  { %1862 = shalt.err (!%p1859_p2)
}
 0x864   :  { %s1863_s30 = scalar_lea.hbm %s2380_s12, 256 }
 0x865   :  { %p1864_p3 = scmp.ne.s32.totalorder %s2380_s12, %s1863_s30  ;;  %p1867_p4 = scmp.lt.u32.totalorder %s1863_s30, %s2380_s12 }
 0x867   :  { %p1869_p5 = pnand %p1867_p4, %p1864_p3 }
 0x869   :  { %1872 = shalt.err (!%p1869_p5)
}
 0x86a   :  { %1259 = dma.vmem_to_hbm [thread:$0]  %s1254_s6, 256, %s2380_s12, [#allocation4], %s1891_s15, %s1891_s15, %s1892_s16  }
 0x86b   :  { %1887 = dma.done.wait [#allocation4], 256  }
 0x86c   :  { %1888 = vsyncadd [#allocation4], 4294967040 }
 0x86d   :  { %1263 = vsyncpa [#allocation3], 1 }
 0x86e   :  { %1264 = vsyncpa [#allocation6], 1 }
 0x86f   :  { %1265 = vsyncpa [#allocation9], 1 }
 0x870   :  { %1266 = vsyncpa [#allocation12], 1 }
 0x871   :  { %1267 = vsyncpa [#allocation15], 1 }
 0x872   :  { %1268 = vsyncpa [#allocation18], 1 }
 0x873   :  { %1269 = vsyncpa [#allocation21], 1 }
 0x874   :  { %1270 = vsyncpa [#allocation4], 1 }

</bundles_post_ra>
